<compile_context>
chip_gen: v7x
topology: tpu7x:2x2x1
jax: 0.10.0
libtpu: 0.0.40
codegen_flags: <defaults>
</compile_context>

<pallas_src>
import functools

import jax
import jax.numpy as jnp
from jax.experimental import pallas as pl
from jax.experimental.pallas import tpu as pltpu


def _round_up(x, m):
    return ((x + m - 1) // m) * m


def _policy_kernel(x_ref, w1_ref, b1_ref, w2_ref, b2_ref, w3v_ref, b3v_ref,
                   logits_ref, policy_ref, value_ref, *, n_actions):
    # Cast in VMEM: obs may arrive bf16/int; avoids a wrapper-side HBM pass.
    x = x_ref[...].astype(jnp.float32)

    # dense_in + ReLU
    h1 = jnp.maximum(
        jnp.dot(x, w1_ref[...], preferred_element_type=jnp.float32) + b1_ref[...],
        0.0)

    # dense_1 + ReLU
    h2 = jnp.maximum(
        jnp.dot(h1, w2_ref[...], preferred_element_type=jnp.float32) + b2_ref[...],
        0.0)

    # Fused dense_2 + dense_out: one MXU pass produces [logits | value].
    lv = jnp.dot(h2, w3v_ref[...], preferred_element_type=jnp.float32) + b3v_ref[...]
    logits = lv[:, :n_actions]

    # softmax over the action axis; exact reciprocal keeps 1e-5 accuracy.
    m = jnp.max(logits, axis=1, keepdims=True)
    e = jnp.exp(logits - m)
    policy = e * pl.reciprocal(jnp.sum(e, axis=1, keepdims=True), approx=False)

    # Direct stores into the three output tiles (no lane-axis concat / zero pad).
    logits_ref[...] = logits
    policy_ref[...] = policy
    value_ref[...] = lv[:, n_actions:n_actions + 1]


def prepare_params(params):
    """One-time fusion of the value head into the logits head.

    Hoisted out of the per-call forward so the pallas_call is the only op on
    the hot path.
    """
    p = dict(params)
    p["w3v"] = jnp.concatenate([params["w3"], params["wv"]], axis=1)  # [h2, n_a+1]
    p["b3v"] = jnp.concatenate([params["b3"], params["bv"]], axis=1)  # [1, n_a+1]
    return p


def crates_craters_policy_forward(obs, params, *, batch_tile=2048):
    """Full MLP forward pass (logits, policy, value) in one Pallas kernel.

    obs:    [B, n_obs] (any float/int dtype; cast to f32 inside the kernel)
    params: dict from prepare_params(init_params(...)) with
            w1 [n_obs, h1], b1 [1, h1], w2 [h1, h2], b2 [1, h2],
            w3v [h2, n_actions+1], b3v [1, n_actions+1]
            (plus the raw w3/b3/wv/bv for reference use).
    returns: (logits [B, n_actions], policy [B, n_actions], value [B])
    """
    if "w3v" not in params:          # fallback; normally fused once up front
        params = prepare_params(params)

    B, n_obs = obs.shape
    n_actions = params["w3"].shape[1]
    w3v, b3v = params["w3v"], params["b3v"]

    # Only pad when B < 8 (minimum sublane tile); otherwise a ragged last grid
    # block handles B % 8 != 0 with zero extra HBM traffic (garbage rows are
    # never stored and every row is independent -- no cross-row reductions).
    rows = B
    if rows < 8:
        obs = jnp.pad(obs, ((0, 8 - rows), (0, 0)))
        rows = 8

    # Large batch tiles amortize per-grid-step overhead and push HBM DMA
    # efficiency toward roofline; cap so the grid keeps >= 2 steps when the
    # batch allows it (v7x megacore sharding via "parallel").
    tile = _round_up(max(batch_tile, 8), 8)
    cap = _round_up((rows + 1) // 2, 8) if rows >= 16 else 8
    tb = max(8, min(tile, cap))
    grid = (pl.cdiv(rows, tb),)

    weights = (params["w1"], params["b1"], params["w2"], params["b2"], w3v, b3v)

    def _resident(arr):
        # Whole weight resident in VMEM; same block for every grid step so it
        # is DMA'd once and reused across all batch tiles.
        nd = arr.ndim
        return pl.BlockSpec(arr.shape, lambda i, nd=nd: (0,) * nd)

    kernel = functools.partial(_policy_kernel, n_actions=n_actions)

    # Advisory cost estimate so XLA schedules/overlaps the custom call sanely.
    h1, h2 = params["w1"].shape[1], params["w2"].shape[1]
    flops = (2 * rows * (n_obs * h1 + h1 * h2 + h2 * (n_actions + 1))
             + rows * (h1 + h2 + 6 * n_actions + 1))
    weight_bytes = sum(int(a.size) * a.dtype.itemsize for a in weights)
    bytes_accessed = (int(obs.size) * obs.dtype.itemsize + weight_bytes
                      + rows * (2 * n_actions + 1) * 4)

    # VMEM at tb=2048 is ~2-3 MiB double-buffered: far under every chip's
    # scoped default, so no vmem_limit_bytes override is needed.
    logits, policy, value = pl.pallas_call(
        kernel,
        out_shape=(jax.ShapeDtypeStruct((rows, n_actions), jnp.float32),
                   jax.ShapeDtypeStruct((rows, n_actions), jnp.float32),
                   jax.ShapeDtypeStruct((rows, 1), jnp.float32)),
        grid=grid,
        in_specs=[pl.BlockSpec((tb, n_obs), lambda i: (i, 0))]
                 + [_resident(a) for a in weights],
        out_specs=(pl.BlockSpec((tb, n_actions), lambda i: (i, 0)),
                   pl.BlockSpec((tb, n_actions), lambda i: (i, 0)),
                   pl.BlockSpec((tb, 1), lambda i: (i, 0))),
        compiler_params=pltpu.CompilerParams(
            dimension_semantics=("parallel",)),   # v7x: shard batch over 2 TCs
        cost_estimate=pl.CostEstimate(
            flops=flops,
            transcendentals=rows * n_actions,
            bytes_accessed=bytes_accessed),
    )(obs, *weights)

    if rows != B:                                  # only hit when B < 8
        logits, policy, value = logits[:B], policy[:B], value[:B]
    return logits, policy, value.reshape(-1)


def init_params(key, n_obs, n_hidden_1, n_hidden_2, n_actions):
    """Deterministic synthetic parameters (nn.Linear shapes, stored transposed)."""
    ks = jax.random.split(key, 8)

    def linear(kw, kb, fan_in, fan_out):
        bound = 1.0 / jnp.sqrt(fan_in)
        w = jax.random.uniform(kw, (fan_in, fan_out), jnp.float32, -bound, bound)
        b = jax.random.uniform(kb, (1, fan_out), jnp.float32, -bound, bound)
        return w, b

    w1, b1 = linear(ks[0], ks[1], n_obs, n_hidden_1)
    w2, b2 = linear(ks[2], ks[3], n_hidden_1, n_hidden_2)
    w3, b3 = linear(ks[4], ks[5], n_hidden_2, n_actions)
    wv, bv = linear(ks[6], ks[7], n_hidden_2, 1)
    return {"w1": w1, "b1": b1, "w2": w2, "b2": b2,
            "w3": w3, "b3": b3, "wv": wv, "bv": bv}


def _reference_forward(obs, p):
    obs = obs.astype(jnp.float32)
    h1 = jnp.maximum(obs @ p["w1"] + p["b1"], 0.0)
    h2 = jnp.maximum(h1 @ p["w2"] + p["b2"], 0.0)
    logits = h2 @ p["w3"] + p["b3"]
    policy = jax.nn.softmax(logits, axis=1)
    value = (h2 @ p["wv"] + p["bv"]).reshape(-1)
    return logits, policy, value


if __name__ == "__main__":
    n_obs, n_hidden_1, n_hidden_2, n_actions = 32, 64, 32, 8

    key = jax.random.PRNGKey(0)
    k_params, k_obs = jax.random.split(key)
    params = prepare_params(
        init_params(k_params, n_obs, n_hidden_1, n_hidden_2, n_actions))

    # Test both an aligned batch and a ragged (non-multiple-of-8) batch.
    for batch in (8, 10):
        obs = jax.random.normal(jax.random.fold_in(k_obs, batch),
                                (batch, n_obs), jnp.float32)

        logits, policy, value = crates_craters_policy_forward(obs, params)
        jax.block_until_ready((logits, policy, value))

        ref_logits, ref_policy, ref_value = _reference_forward(obs, params)
        assert logits.shape == (batch, n_actions)
        assert policy.shape == (batch, n_actions)
        assert value.shape == (batch,)
        assert jnp.allclose(logits, ref_logits, atol=1e-5, rtol=1e-5)
        assert jnp.allclose(policy, ref_policy, atol=1e-5, rtol=1e-5)
        assert jnp.allclose(value, ref_value, atol=1e-5, rtol=1e-5)

    print("KERNEL_OK")
</pallas_src>

<mosaic_0001>
module attributes {stable_mosaic.version = 11 : i64} {
  func.func @_policy_kernel(%arg0: i32, %arg1: memref<8x32xf32, #tpu.memory_space<vmem>>, %arg2: memref<32x64xf32, #tpu.memory_space<vmem>>, %arg3: memref<1x64xf32, #tpu.memory_space<vmem>>, %arg4: memref<64x32xf32, #tpu.memory_space<vmem>>, %arg5: memref<1x32xf32, #tpu.memory_space<vmem>>, %arg6: memref<32x9xf32, #tpu.memory_space<vmem>>, %arg7: memref<1x9xf32, #tpu.memory_space<vmem>>, %arg8: memref<8x8xf32, #tpu.memory_space<vmem>>, %arg9: memref<8x8xf32, #tpu.memory_space<vmem>>, %arg10: memref<8x1xf32, #tpu.memory_space<vmem>>) attributes {dimension_semantics = [#tpu.dimension_semantics<parallel>], iteration_bounds = array<i64: 1>, scalar_prefetch = 0 : i64, scratch_operands = 0 : i64, tpu.core_type = #tpu.core_type<tc>, window_params = [{transform_indices = @transform_0, window_bounds = array<i64: 8, 32>}, {pipeline_mode = #tpu.pipeline_mode<synchronous>, transform_indices = @transform_1, window_bounds = array<i64: 32, 64>}, {pipeline_mode = #tpu.pipeline_mode<synchronous>, transform_indices = @transform_2, window_bounds = array<i64: 1, 64>}, {pipeline_mode = #tpu.pipeline_mode<synchronous>, transform_indices = @transform_3, window_bounds = array<i64: 64, 32>}, {pipeline_mode = #tpu.pipeline_mode<synchronous>, transform_indices = @transform_4, window_bounds = array<i64: 1, 32>}, {pipeline_mode = #tpu.pipeline_mode<synchronous>, transform_indices = @transform_5, window_bounds = array<i64: 32, 9>}, {pipeline_mode = #tpu.pipeline_mode<synchronous>, transform_indices = @transform_6, window_bounds = array<i64: 1, 9>}, {transform_indices = @transform_7, window_bounds = array<i64: 8, 8>}, {transform_indices = @transform_8, window_bounds = array<i64: 8, 8>}, {transform_indices = @transform_9, window_bounds = array<i64: 8, 1>}]} {
    %c0 = arith.constant 0 : index
    %c0_0 = arith.constant 0 : index
    %0 = vector.load %arg1[%c0, %c0_0] : memref<8x32xf32, #tpu.memory_space<vmem>>, vector<8x32xf32>
    %c0_1 = arith.constant 0 : index
    %c0_2 = arith.constant 0 : index
    %1 = vector.load %arg2[%c0_1, %c0_2] : memref<32x64xf32, #tpu.memory_space<vmem>>, vector<32x64xf32>
    %cst = arith.constant dense<0.000000e+00> : vector<8x64xf32>
    %2 = tpu.matmul %0, %1, %cst {dimension_numbers = #tpu.dot_dimension_numbers<[1], [0], [0], [1], [0, 0, 1, 1], [], []>} : vector<8x32xf32>, vector<32x64xf32>, vector<8x64xf32> -> vector<8x64xf32>
    %c0_3 = arith.constant 0 : index
    %c0_4 = arith.constant 0 : index
    %3 = vector.load %arg3[%c0_3, %c0_4] : memref<1x64xf32, #tpu.memory_space<vmem>>, vector<1x64xf32>
    %4 = vector.broadcast %3 : vector<1x64xf32> to vector<8x64xf32>
    %5 = arith.addf %2, %4 : vector<8x64xf32>
    %cst_5 = arith.constant 0.000000e+00 : f32
    %6 = vector.broadcast %cst_5 : f32 to vector<8x64xf32>
    %7 = arith.maximumf %5, %6 : vector<8x64xf32>
    %c0_6 = arith.constant 0 : index
    %c0_7 = arith.constant 0 : index
    %8 = vector.load %arg4[%c0_6, %c0_7] : memref<64x32xf32, #tpu.memory_space<vmem>>, vector<64x32xf32>
    %cst_8 = arith.constant dense<0.000000e+00> : vector<8x32xf32>
    %9 = tpu.matmul %7, %8, %cst_8 {dimension_numbers = #tpu.dot_dimension_numbers<[1], [0], [0], [1], [0, 0, 1, 1], [], []>} : vector<8x64xf32>, vector<64x32xf32>, vector<8x32xf32> -> vector<8x32xf32>
    %c0_9 = arith.constant 0 : index
    %c0_10 = arith.constant 0 : index
    %10 = vector.load %arg5[%c0_9, %c0_10] : memref<1x32xf32, #tpu.memory_space<vmem>>, vector<1x32xf32>
    %11 = vector.broadcast %10 : vector<1x32xf32> to vector<8x32xf32>
    %12 = arith.addf %9, %11 : vector<8x32xf32>
    %cst_11 = arith.constant 0.000000e+00 : f32
    %13 = vector.broadcast %cst_11 : f32 to vector<8x32xf32>
    %14 = arith.maximumf %12, %13 : vector<8x32xf32>
    %c0_12 = arith.constant 0 : index
    %c0_13 = arith.constant 0 : index
    %15 = vector.load %arg6[%c0_12, %c0_13] : memref<32x9xf32, #tpu.memory_space<vmem>>, vector<32x9xf32>
    %cst_14 = arith.constant dense<0.000000e+00> : vector<8x9xf32>
    %16 = tpu.matmul %14, %15, %cst_14 {dimension_numbers = #tpu.dot_dimension_numbers<[1], [0], [0], [1], [0, 0, 1, 1], [], []>} : vector<8x32xf32>, vector<32x9xf32>, vector<8x9xf32> -> vector<8x9xf32>
    %c0_15 = arith.constant 0 : index
    %c0_16 = arith.constant 0 : index
    %17 = vector.load %arg7[%c0_15, %c0_16] : memref<1x9xf32, #tpu.memory_space<vmem>>, vector<1x9xf32>
    %18 = vector.broadcast %17 : vector<1x9xf32> to vector<8x9xf32>
    %19 = arith.addf %16, %18 : vector<8x9xf32>
    %20 = vector.extract_strided_slice %19 {offsets = [0, 0], sizes = [8, 8], strides = [1, 1]} : vector<8x9xf32> to vector<8x8xf32>
    %cst_17 = arith.constant dense<0xFF800000> : vector<8xf32>
    %21 = vector.multi_reduction <maximumf>, %20, %cst_17 [1] : vector<8x8xf32> to vector<8xf32>
    %22 = vector.shape_cast %21 : vector<8xf32> to vector<8x1xf32>
    %23 = vector.broadcast %22 : vector<8x1xf32> to vector<8x8xf32>
    %24 = arith.subf %20, %23 : vector<8x8xf32>
    %25 = math.exp %24 : vector<8x8xf32>
    %cst_18 = arith.constant dense<0.000000e+00> : vector<8xf32>
    %26 = vector.multi_reduction <add>, %25, %cst_18 [1] : vector<8x8xf32> to vector<8xf32>
    %27 = vector.shape_cast %26 : vector<8xf32> to vector<8x1xf32>
    %28 = tpu.reciprocal %27 : vector<8x1xf32> -> vector<8x1xf32>
    %29 = vector.broadcast %28 : vector<8x1xf32> to vector<8x8xf32>
    %30 = arith.mulf %25, %29 : vector<8x8xf32>
    %c0_19 = arith.constant 0 : index
    %c0_20 = arith.constant 0 : index
    %31 = vector.load %arg8[%c0_19, %c0_20] : memref<8x8xf32, #tpu.memory_space<vmem>>, vector<8x8xf32>
    tpu.vector_store %arg8[%c0_19, %c0_20], %20 {strides = array<i32>} : memref<8x8xf32, #tpu.memory_space<vmem>>, vector<8x8xf32>,
    %c0_21 = arith.constant 0 : index
    %c0_22 = arith.constant 0 : index
    %32 = vector.load %arg9[%c0_21, %c0_22] : memref<8x8xf32, #tpu.memory_space<vmem>>, vector<8x8xf32>
    tpu.vector_store %arg9[%c0_21, %c0_22], %30 {strides = array<i32>} : memref<8x8xf32, #tpu.memory_space<vmem>>, vector<8x8xf32>,
    %33 = vector.extract_strided_slice %19 {offsets = [0, 8], sizes = [8, 1], strides = [1, 1]} : vector<8x9xf32> to vector<8x1xf32>
    %c0_23 = arith.constant 0 : index
    %c0_24 = arith.constant 0 : index
    %34 = vector.load %arg10[%c0_23, %c0_24] : memref<8x1xf32, #tpu.memory_space<vmem>>, vector<8x1xf32>
    tpu.vector_store %arg10[%c0_23, %c0_24], %33 {strides = array<i32>} : memref<8x1xf32, #tpu.memory_space<vmem>>, vector<8x1xf32>,
    return
  }
  func.func @transform_0(%arg0: i32) -> (i32, i32) {
    %c0_i32 = arith.constant 0 : i32
    %c0_i32_0 = arith.constant 0 : i32
    return %arg0, %c0_i32 : i32, i32
  }
  func.func @transform_1(%arg0: i32) -> (i32, i32) {
    %c0_i32 = arith.constant 0 : i32
    %c0_i32_0 = arith.constant 0 : i32
    %c0_i32_1 = arith.constant 0 : i32
    return %c0_i32, %c0_i32_0 : i32, i32
  }
  func.func @transform_2(%arg0: i32) -> (i32, i32) {
    %c0_i32 = arith.constant 0 : i32
    %c0_i32_0 = arith.constant 0 : i32
    %c0_i32_1 = arith.constant 0 : i32
    return %c0_i32, %c0_i32_0 : i32, i32
  }
  func.func @transform_3(%arg0: i32) -> (i32, i32) {
    %c0_i32 = arith.constant 0 : i32
    %c0_i32_0 = arith.constant 0 : i32
    %c0_i32_1 = arith.constant 0 : i32
    return %c0_i32, %c0_i32_0 : i32, i32
  }
  func.func @transform_4(%arg0: i32) -> (i32, i32) {
    %c0_i32 = arith.constant 0 : i32
    %c0_i32_0 = arith.constant 0 : i32
    %c0_i32_1 = arith.constant 0 : i32
    return %c0_i32, %c0_i32_0 : i32, i32
  }
  func.func @transform_5(%arg0: i32) -> (i32, i32) {
    %c0_i32 = arith.constant 0 : i32
    %c0_i32_0 = arith.constant 0 : i32
    %c0_i32_1 = arith.constant 0 : i32
    return %c0_i32, %c0_i32_0 : i32, i32
  }
  func.func @transform_6(%arg0: i32) -> (i32, i32) {
    %c0_i32 = arith.constant 0 : i32
    %c0_i32_0 = arith.constant 0 : i32
    %c0_i32_1 = arith.constant 0 : i32
    return %c0_i32, %c0_i32_0 : i32, i32
  }
  func.func @transform_7(%arg0: i32) -> (i32, i32) {
    %c0_i32 = arith.constant 0 : i32
    %c0_i32_0 = arith.constant 0 : i32
    return %arg0, %c0_i32 : i32, i32
  }
  func.func @transform_8(%arg0: i32) -> (i32, i32) {
    %c0_i32 = arith.constant 0 : i32
    %c0_i32_0 = arith.constant 0 : i32
    return %arg0, %c0_i32 : i32, i32
  }
  func.func @transform_9(%arg0: i32) -> (i32, i32) {
    %c0_i32 = arith.constant 0 : i32
    %c0_i32_0 = arith.constant 0 : i32
    return %arg0, %c0_i32 : i32, i32
  }
}

</mosaic_0001>

<bundles_post_ra>
// kernel: tpu_custom_call.1
= control target key start
LH: loop header
LB: loop body
LE: loop exit
PB: predicated region body
PF: predicated region fallthrough
CT: control target
= control target key end

     0   :  { %15 = vsyncpa [#allocation3], 0  ;;  %v492_v3 = vmov 0.0|0.0   ;;  %vm493_vm0 = vmmov 0   ;;  %v494_v6 = vmov 0.0   ;;  %s644_s0 = inlined_call_operand.vmem [shape: f32[8,32], index: 0, kind: input, shape index: {}]   ;;  %s645_s1 = inlined_call_operand.vmem [shape: f32[32,64], index: 1, kind: input, shape index: {}]   ;;  %s646_s2 = inlined_call_operand.vmem [shape: f32[1,64], index: 2, kind: input, shape index: {}]   ;;  %s647_s3 = inlined_call_operand.vmem [shape: f32[64,32], index: 3, kind: input, shape index: {}]   ;;  %s648_s4 = inlined_call_operand.vmem [shape: f32[1,32], index: 4, kind: input, shape index: {}]   ;;  %s649_s5 = inlined_call_operand.vmem [shape: f32[32,9], index: 5, kind: input, shape index: {}]   ;;  %s650_s6 = inlined_call_operand.vmem [shape: f32[1,9], index: 6, kind: input, shape index: {}]   ;;  %s651_s7 = inlined_call_operand.hbm [shape: f32[8,8], index: 7, kind: output, shape index: {0}]   ;;  %s652_s8 = inlined_call_operand.hbm [shape: f32[8,8], index: 8, kind: output, shape index: {1}]   ;;  %s653_s9 = inlined_call_operand.vmem [shape: f32[8,1], index: 9, kind: output, shape index: {2}]  }
   0x1   :  { %v32_v0 = vld [vmem:[%s645_s1] sm:$0xff]  ;;  %v33_v1 = vld [vmem:[%s645_s1 + $0x8] sm:$0xff]  ;;  %v34_v2 = vld [vmem:[%s645_s1 + $0x10] sm:$0xff]  ;;  %410 = vmatprep.subr.bf16.mxu0 %v492_v3  ;;  %377 = vmatprep.mubr.msk.f32.mxu0 %vm493_vm0, %v494_v6 }
   0x2   :  { %v411_v4 = vpack.c.bf16 %v33_v1, %v32_v0  ;;  %v35_v5 = vld [vmem:[%s645_s1 + $0x18] sm:$0xff]  ;;  %v118_v7 = vld [vmem:[%s647_s3] sm:$0xff]  ;;  %416 = vmatprep.subr.bf16.mxu1 %v492_v3  ;;  %v119_v8 = vld [vmem:[%s647_s3 + $0x8] sm:$0xff]  ;;  %396 = vmatprep.mubr.msk.f32.mxu1 %vm493_vm0, %v494_v6 }
   0x3   :  { %v120_v9 = vld [vmem:[%s647_s3 + $0x10] sm:$0xff]  ;;  %v121_v10 = vld [vmem:[%s647_s3 + $0x18] sm:$0xff]  ;;  %v414_v11 = vpack.c.bf16 %v35_v5, %v34_v2  ;;  %v417_v12 = vpack.c.bf16 %v119_v8, %v118_v7 }
   0x4   :  { %412 = vmatpush3.bf16.msra.mxu0 %v411_v4 }
   0x5   :  { %413 = vmatprep.subr.bf16.mxu0 %v492_v3 }
   0x6   :  { %16 = vsyncpa [#allocation5], 0  ;;  %418 = vmatpush3.bf16.msra.mxu1 %v417_v12  ;;  %v420_v13 = vpack.c.bf16 %v121_v10, %v120_v9  ;;  %v122_v14 = vld [vmem:[%s647_s3 + $0x20] sm:$0xff]  ;;  %v123_v15 = vld [vmem:[%s647_s3 + $0x28] sm:$0xff]  ;;  %vm43_vm1 = vcmask 261120   ;;  %vm133_vm2 = vcmask 523264  }
   0x7   :  { %419 = vmatprep.subr.bf16.mxu1 %v492_v3  ;;  %v31_v16 = vld [vmem:[%s644_s0] sm:$0xff]  ;;  %v423_v17 = vpack.c.bf16 %v123_v15, %v122_v14  ;;  %v124_v18 = vld [vmem:[%s647_s3 + $0x30] sm:$0xff]  ;;  %v125_v19 = vld [vmem:[%s647_s3 + $0x38] sm:$0xff]  ;;  %vm292_vm3 = vcmask 64512   ;;  %vm310_vm4 = vcmask 7168  }
   0x8   :  { %415 = vmatpush3.bf16.msra.mxu0 %v414_v11  ;;  %v426_v20 = vpack.c.bf16 %v125_v19, %v124_v18  ;;  %v208_v21 = vld [vmem:[%s649_s5] sm:$0xff]  ;;  %v209_v22 = vld [vmem:[%s649_s5 + $0x8] sm:$0xff]  ;;  %v210_v29 = vld [vmem:[%s649_s5 + $0x10] sm:$0xff] }
   0x9   :  { %428 = vmatprep.subr.bf16.mxu0 %v492_v3  ;;  %v429_v23 = vpack.c.bf16 %v209_v22, %v208_v21  ;;  %v344_v24 = vld [vmem:[%s646_s2] ss:$0 sm:$0xff]  ;;  %v211_v30 = vld [vmem:[%s649_s5 + $0x18] sm:$0xff]  ;;  %s495_s5 = smov 120  }
   0xa   :  { %421 = vmatpush3.bf16.msra.mxu1 %v420_v13  ;;  %v432_v31 = vpack.c.bf16 %v211_v30, %v210_v29  ;;  %v346_v32 = vld [vmem:[%s648_s4] ss:$0 sm:$0xff] }
   0xb   :  { %378 = vmatmul.mubr.msk.f32.vlgmr.msra.gmra.mrb[0].mxu0 %vm43_vm1, %v31_v16  ;;  %422 = vmatprep.subr.bf16.mxu1 %v492_v3  ;;  %v348_v37 = vld [vmem:[%s650_s6] ss:$0 sm:$0xff]  ;;  %s496_s6 = smov [#allocation2]  }
   0xc   :  { %407 = vmatprep.mubr.msk.f32.mxu0 %vm493_vm0, %v494_v6  ;;  %430 = vmatpush3.bf16.msra.mxu0 %v429_v23  ;;  %s318_s1 = sshll.u32 %s496_s6, 4  ;;  %s319_s1 = int_to_ptr.vmem [resolvable:$true] %s318_s1 }
   0xd   :  { %431 = vmatprep.subr.bf16.mxu0 %v492_v3  ;;  %s444_s25 = scalar_lea.vmem %s319_s1, 128  ;;  %p449_p1 = scmp.lt.s32.totalorder %s319_s1, %s319_s1 }
   0xe   :  { %424 = vmatpush3.bf16.msra.mxu1 %v423_v17  ;;  %p445_p0 = scmp.ne.s32.totalorder %s319_s1, %s444_s25  ;;  %p450_p2 = scmp.lt.s32.totalorder %s444_s25, %s444_s25 }
   0xf   :  { %425 = vmatprep.subr.bf16.mxu1 %v492_v3 }
  0x10   :  { %433 = vmatpush3.bf16.msra.mxu0 %v432_v31  ;;  %p451_p3 = por %p450_p2, %p449_p1 }
  0x12   :  { %427 = vmatpush3.bf16.msra.mxu1 %v426_v20  ;;  %p452_p4 = pnand %p451_p3, %p445_p0 }
  0xde   :  { %v113_v25 = vpop.f32.mrb[0].mxu0 }
  0xdf   :  { %v114_v26 = vadd.f32 %v344_v24, %v113_v25  ;;  %v379_v27 = vpop.f32.mrb[1].mxu0 }
  0xe1   :  { %v117_v28 = vmax.f32 %v114_v26, 0.0 }
  0xe3   :  { %397 = vmatmul.mubr.msk.f32.vlgmr.msra.gmra.mrb[0].mxu1 %vm133_vm2, %v117_v28 }
 0x1b6   :  { %v203_v33 = vpop.f32.mrb[0].mxu1 }
 0x1b7   :  { %v204_v34 = vadd.f32 %v346_v32, %v203_v33  ;;  %v398_v35 = vpop.f32.mrb[1].mxu1 }
 0x1b9   :  { %v207_v36 = vmax.f32 %v204_v34, 0.0 }
 0x1bb   :  { %408 = vmatmul.mubr.msk.f32.vlgmr.msra.gmra.mrb[2].mxu0 %vm43_vm1, %v207_v36 }
 0x28e   :  { %v288_v38 = vpop.f32.mrb[2].mxu0 }
 0x28f   :  { %v289_v39 = vadd.f32 %v348_v37, %v288_v38  ;;  %v409_v40 = vpop.f32.mrb[3].mxu0 }
 0x291   :  { %307 = vrot.lane.b32.xlu1 %v289_v39, %s495_s5  ;;  %v293_v41 = vsel %vm292_vm3, %v289_v39, -inf  ;;  %304 = vst.msk [vmem:[#allocation2] sm:$0xff] %vm292_vm3, %v289_v39 }
 0x292   :  { %294 = vmax.xlane.f32.xlu0 %v293_v41 }
 0x303   :  { %v308_v42 = vpop.permute.xlu1 %307 }
 0x304   :  { %311 = vst.msk [vmem:[%s653_s9] sm:$0xff] %vm310_vm4, %v308_v42 }
 0x31f   :  { %v295_v43 = vpop.xlane.xlu0 %294 }
 0x320   :  { %v296_v44 = vsub.f32 %v289_v39, %v295_v43 }
 0x322   :  { %v297_v45 = vmul.f32 1.442695, %v296_v44 }
 0x324   :  { %440 = vpow2.f32 %v297_v45 }
 0x32e   :  { %v441_v46 = vpop.eup %440 }
 0x32f   :  { %v299_v47 = vsel %vm292_vm3, %v441_v46, 0.0 }
 0x330   :  { %300 = vadd.xlane.f32.xlu0 %v299_v47 }
 0x331   :  { %455 = shalt.err (!%p452_p4)
}
 0x332   :  { %s456_s27 = scalar_lea.hbm %s651_s7, 128 }
 0x333   :  { %p457_p5 = scmp.ne.s32.totalorder %s651_s7, %s456_s27  ;;  %p460_p6 = scmp.lt.u32.totalorder %s456_s27, %s651_s7 }
 0x335   :  { %p462_p7 = pnand %p460_p6, %p457_p5 }
 0x337   :  { %465 = shalt.err (!%p462_p7)
}
 0x338   :  { %321 = dma.vmem_to_hbm [thread:$0]  %s319_s1, 128, %s651_s7, [#allocation3]  }
 0x339   :  { %s497_s0 = smov [#allocation4]  }
 0x33a   :  { %s328_s13 = sshll.u32 %s497_s0, 4  ;;  %s329_s13 = int_to_ptr.vmem [resolvable:$true] %s328_s13 }
 0x33b   :  { %s466_s14 = scalar_lea.vmem %s329_s13, 128  ;;  %p471_p9 = scmp.lt.s32.totalorder %s329_s13, %s329_s13 }
 0x33c   :  { %p467_p8 = scmp.ne.s32.totalorder %s329_s13, %s466_s14  ;;  %p472_p10 = scmp.lt.s32.totalorder %s466_s14, %s466_s14 }
 0x33e   :  { %p473_p11 = por %p472_p10, %p471_p9 }
 0x340   :  { %p474_p12 = pnand %p473_p11, %p467_p8 }
 0x3bd   :  { %v301_v48 = vpop.xlane.xlu0 %300 }
 0x3be   :  { %442 = vrcp.f32 %v301_v48 }
 0x3c8   :  { %v443_v49 = vpop.eup %442 }
 0x3c9   :  { %v303_v50 = vmul.f32 %v443_v49, %v441_v46 }
 0x3cb   :  { %305 = vst.msk [vmem:[#allocation4] sm:$0xff] %vm292_vm3, %v303_v50 }
 0x3cc   :  { %477 = shalt.err (!%p474_p12)
}
 0x3cd   :  { %s478_s7 = scalar_lea.hbm %s652_s8, 128 }
 0x3ce   :  { %p479_p13 = scmp.ne.s32.totalorder %s652_s8, %s478_s7  ;;  %p482_p0 = scmp.lt.u32.totalorder %s478_s7, %s652_s8 }
 0x3d0   :  { %p484_p1 = pnand %p482_p0, %p479_p13 }
 0x3d2   :  { %487 = shalt.err (!%p484_p1)
}
 0x3d3   :  { %331 = dma.vmem_to_hbm [thread:$0]  %s329_s13, 128, %s652_s8, [#allocation5]  }
 0x3d4   :  { %488 = dma.done.wait [#allocation3], 128  }
 0x3d5   :  { %489 = vsyncadd [#allocation3], 4294967168 }
 0x3d6   :  { %490 = dma.done.wait [#allocation5], 128  }
 0x3d7   :  { %491 = vsyncadd [#allocation5], 4294967168 }
 0x3d8   :  { %342 = vsyncpa [#allocation3], 1 }
 0x3d9   :  { %343 = vsyncpa [#allocation5], 1 }

</bundles_post_ra>
